<compile_context>
chip_gen: v6e
topology: v6e:2x2x1
jax: 0.10.0
libtpu: 0.0.40
codegen_flags: <defaults>
</compile_context>

<pallas_src>
import functools

import jax
import jax.numpy as jnp
from jax.experimental import pallas as pl
from jax.experimental.pallas import tpu as pltpu

# ---- tuning constants -------------------------------------------------------
_MIN_LANES = 128                          # lane quantum (vreg lane width)
_MAX_LANES = 4096                         # cap on slab width
_TARGET_BLOCK_BYTES = 4 * 1024 * 1024     # ~4 MiB blocks: mem-bound sweet spot
_VMEM_LIMIT_BYTES = 32 * 1024 * 1024      # explicit scoped VMEM (2 in + 2 out bufs ~16 MiB)
_SMALL_BYTES = 64 * 1024                  # below this: plain jnp (let XLA fuse)


def _h_swish_kernel(promote_to_f32, x_ref, o_ref):
    # h_sigmoid(x) = relu6(x + 3) / 6 ; h_swish(x) = x * h_sigmoid(x)
    x = x_ref[...]
    if promote_to_f32:
        x = x.astype(jnp.float32)
    hs = jnp.clip(x + 3.0, 0.0, 6.0) * (1.0 / 6.0)
    o_ref[...] = (x * hs).astype(o_ref.dtype)


def _h_swish_jnp(x):
    """Plain-jnp fallback for tiny tensors / ragged tails (XLA fuses this)."""
    xf = x.astype(jnp.float32)
    return (xf * (jnp.clip(xf + 3.0, 0.0, 6.0) * (1.0 / 6.0))).astype(x.dtype)


def _bf16_native_ok() -> bool:
    """bf16 VALU exists on v6e / v7x; promote to f32 on <= v5 chips."""
    try:
        kind = jax.devices()[0].device_kind.lower()
    except Exception:  # pragma: no cover - be conservative
        return False
    return not any(tag in kind for tag in ("v2", "v3", "v4", "v5"))


def _h_swish_2d(x2d: jax.Array) -> jax.Array:
    """Run the Pallas kernel on a (rows, lanes) slab; lanes % 128 == 0."""
    rows, lanes = x2d.shape
    dtype = x2d.dtype
    itemsize = jnp.dtype(dtype).itemsize

    # sublane packing: 8 rows/vreg for 4-byte, 16 for bf16/f16, 32 for 1-byte
    sub = 8 * max(1, 4 // itemsize)

    # compute dtype: native for f32 always, native bf16 only on v6e/v7x
    if dtype == jnp.float32:
        promote = False
    elif dtype == jnp.bfloat16:
        promote = not _bf16_native_ok()
    else:
        promote = True

    # block rows sized for ~_TARGET_BLOCK_BYTES, rounded down to `sub` sublanes
    tr = max(sub, (_TARGET_BLOCK_BYTES // (lanes * itemsize)) // sub * sub)
    if tr >= rows:
        if rows >= 2 * sub:
            # Split into >= 2 grid steps so both v7x TensorCores stream
            # ("parallel" only helps when the grid has >= 2 iterations).
            tr = (pl.cdiv(rows, 2) + sub - 1) // sub * sub
        else:
            # Tiny row extent: one block covering the full dim (always legal).
            tr = rows
    grid = (pl.cdiv(rows, tr),)  # ragged last block is fine for elementwise ops

    return pl.pallas_call(
        functools.partial(_h_swish_kernel, promote),
        out_shape=jax.ShapeDtypeStruct((rows, lanes), dtype),
        grid_spec=pltpu.PrefetchScalarGridSpec(
            num_scalar_prefetch=0,
            grid=grid,
            in_specs=[pl.BlockSpec((tr, lanes), lambda i: (i, 0))],
            out_specs=pl.BlockSpec((tr, lanes), lambda i: (i, 0)),
        ),
        compiler_params=pltpu.CompilerParams(
            dimension_semantics=("parallel",),
            vmem_limit_bytes=_VMEM_LIMIT_BYTES,
        ),
    )(x2d)


def h_swish(x: jax.Array) -> jax.Array:
    """Elementwise h_swish for any-shaped input (NCHW expected)."""
    orig_shape = x.shape
    total = x.size
    if total == 0:
        return x
    itemsize = jnp.dtype(x.dtype).itemsize

    # Tiny tensors: a standalone pallas_call costs more than the op itself.
    if total * itemsize < _SMALL_BYTES:
        return _h_swish_jnp(x)

    x_flat = jnp.ravel(x)

    # Adaptive lane width: largest multiple of 128 (<= _MAX_LANES) dividing
    # `total` -> zero-copy reshape, no tail, 1R + 1W of HBM only.
    lanes = 0
    for w in range(_MAX_LANES, _MIN_LANES - 1, -_MIN_LANES):
        if total % w == 0:
            lanes = w
            break

    if lanes:
        rows = total // lanes
        out2d = _h_swish_2d(x_flat.reshape(rows, lanes))
        return out2d.reshape(orig_shape)

    # Rare path: large tensor whose size is not a multiple of 128.
    # Kernel on the 1024-aligned prefix, plain-jnp tail, stitch.
    lanes = 1024
    main = (total // lanes) * lanes
    out_main = _h_swish_2d(x_flat[:main].reshape(main // lanes, lanes)).reshape(-1)
    out_tail = _h_swish_jnp(x_flat[main:])
    return jnp.concatenate([out_main, out_tail]).reshape(orig_shape)


def h_swish_ref(x):
    xf = x.astype(jnp.float32)
    return (xf * (jnp.clip(xf + 3.0, 0.0, 6.0) / 6.0)).astype(x.dtype)


if __name__ == "__main__":
    root = jax.random.PRNGKey(0)
    k1, k2, k3, k4, k5 = jax.random.split(root, 5)

    # 1) Kernel path, >=2 grid steps + ragged last block (f32 NCHW activation).
    x1 = jax.random.normal(k1, (2, 24, 56, 56), dtype=jnp.float32) * 4.0
    o1 = jax.block_until_ready(h_swish(x1))
    assert o1.shape == x1.shape and o1.dtype == x1.dtype
    assert jnp.allclose(o1, h_swish_ref(x1), atol=1e-6, rtol=1e-5)

    # 2) Small tensor consistent with the module spec -> fused-jnp fast path.
    x2 = jax.random.normal(k2, (2, 4, 16, 16), dtype=jnp.float32) * 4.0
    o2 = jax.block_until_ready(h_swish(x2))
    assert jnp.allclose(o2, h_swish_ref(x2), atol=1e-6, rtol=1e-5)

    # 3) Native-bf16 kernel path (half the HBM traffic; bf16 VALU on v6e/v7x).
    x3 = (jax.random.normal(k3, (2, 24, 28, 28)) * 4.0).astype(jnp.bfloat16)
    o3 = jax.block_until_ready(h_swish(x3))
    assert o3.dtype == jnp.bfloat16 and o3.shape == x3.shape
    assert jnp.allclose(o3.astype(jnp.float32), h_swish_ref(x3).astype(jnp.float32),
                        atol=2e-2, rtol=2e-2)

    # 4) Tiny awkward size -> jnp fallback (no kernel launch overhead).
    x4 = jax.random.normal(k4, (3, 5, 7, 11), dtype=jnp.float32) * 4.0
    o4 = jax.block_until_ready(h_swish(x4))
    assert jnp.allclose(o4, h_swish_ref(x4), atol=1e-6, rtol=1e-5)

    # 5) Large tensor with size not divisible by 128 -> prefix-kernel + tail.
    x5 = jax.random.normal(k5, (1, 5, 99, 99), dtype=jnp.float32) * 4.0
    o5 = jax.block_until_ready(h_swish(x5))
    assert jnp.allclose(o5, h_swish_ref(x5), atol=1e-6, rtol=1e-5)

    print("KERNEL_OK")
</pallas_src>

<mosaic_0001>
module attributes {stable_mosaic.version = 11 : i64} {
  func.func @_h_swish_kernel(%arg0: i32, %arg1: memref<24x3584xf32, #tpu.memory_space<vmem>>, %arg2: memref<24x3584xf32, #tpu.memory_space<vmem>>) attributes {dimension_semantics = [#tpu.dimension_semantics<parallel>], iteration_bounds = array<i64: 2>, scalar_prefetch = 0 : i64, scratch_operands = 0 : i64, tpu.core_type = #tpu.core_type<tc>, window_params = [{transform_indices = @transform_0, window_bounds = array<i64: 24, 3584>}, {transform_indices = @transform_1, window_bounds = array<i64: 24, 3584>}]} {
    %c0 = arith.constant 0 : index
    %c0_0 = arith.constant 0 : index
    %0 = vector.load %arg1[%c0, %c0_0] : memref<24x3584xf32, #tpu.memory_space<vmem>>, vector<24x3584xf32>
    %cst = arith.constant 3.000000e+00 : f32
    %1 = vector.broadcast %cst : f32 to vector<24x3584xf32>
    %2 = arith.addf %0, %1 : vector<24x3584xf32>
    %cst_1 = arith.constant 0.000000e+00 : f32
    %cst_2 = arith.constant 6.000000e+00 : f32
    %3 = vector.broadcast %cst_1 : f32 to vector<24x3584xf32>
    %4 = arith.maximumf %3, %2 : vector<24x3584xf32>
    %5 = vector.broadcast %cst_2 : f32 to vector<24x3584xf32>
    %6 = arith.minimumf %5, %4 : vector<24x3584xf32>
    %cst_3 = arith.constant 0.166666672 : f32
    %7 = vector.broadcast %cst_3 : f32 to vector<24x3584xf32>
    %8 = arith.mulf %6, %7 : vector<24x3584xf32>
    %9 = arith.mulf %0, %8 : vector<24x3584xf32>
    %c0_4 = arith.constant 0 : index
    %c0_5 = arith.constant 0 : index
    %10 = vector.load %arg2[%c0_4, %c0_5] : memref<24x3584xf32, #tpu.memory_space<vmem>>, vector<24x3584xf32>
    tpu.vector_store %arg2[%c0_4, %c0_5], %9 {strides = array<i32>} : memref<24x3584xf32, #tpu.memory_space<vmem>>, vector<24x3584xf32>,
    return
  }
  func.func @transform_0(%arg0: i32) -> (i32, i32) {
    %c0_i32 = arith.constant 0 : i32
    %c0_i32_0 = arith.constant 0 : i32
    return %arg0, %c0_i32 : i32, i32
  }
  func.func @transform_1(%arg0: i32) -> (i32, i32) {
    %c0_i32 = arith.constant 0 : i32
    %c0_i32_0 = arith.constant 0 : i32
    return %arg0, %c0_i32 : i32, i32
  }
}

</mosaic_0001>

<bundles_post_ra>
// kernel: tpu_custom_call.1
= control target key start
LH: loop header
LB: loop body
LE: loop exit
PB: predicated region body
PF: predicated region fallthrough
CT: control target
= control target key end

     0   :  { %6 = vsyncpa [#allocation3], 0  ;;  %s1483_s0 = inlined_call_operand.hbm [shape: f32[42,3584], index: 0, kind: input, shape index: {}]   ;;  %s1484_s1 = inlined_call_operand.hbm [shape: f32[42,3584], index: 1, kind: output, shape index: {}]  }
   0x1   :  { %8 = vsyncpa [#allocation3 + $0x1], 0 }
   0x2   :  { %9 = vsyncpa [#allocation4], 0 }
   0x3   :  { %11 = vsyncpa [#allocation4 + $0x1], 0  ;;  %s988_s6 = smov 0   ;;  %s990_s7 = smov 0  }
   0x4   :  { %s992_s8 = smov 0   ;;  %s994_s9 = smov 0  }
   0x5 LB: > { %s1009_s10 = sadd.s32 4294967295, %s970_s9   ;;  %s814_s11 = sadd.s32 4294967294, %s970_s9   ;;  %s970_s9 = sphi %s994_s9, %s1499_s9   ;;  %s966_s8 = sphi %s992_s8, %s1498_s8   ;;  %s962_s7 = sphi %s990_s7, %s1497_s7   ;;  %s958_s6 = sphi %s988_s6, %s1496_s6  }
   0x6   : > { %s1013_s12 = sadd.s32 1, %s970_s9   ;;  %s24_s13 = sadd.s32 1, %s966_s8 }
   0x7   : > { %s21_s14 = ssub.s32 %s970_s9, %s1013_s12  ;;  %p31_p0 = scmp.ne.s32.totalorder %s966_s8, %s962_s7 }
   0x8   : > { %p22_p1 = scmp.eq.s32.totalorder %s21_s14, 0  ;;  %p32_p2 = scmp.eq.s32.totalorder %s970_s9, 0 }
   0x9   : > { %p37_p3 = scmp.ne.s32.totalorder %s962_s7, %s958_s6  ;;  %p38_p4 = scmp.eq.s32.totalorder %s1009_s10, 0 }
   0xa   : > { %s1025_s15 = scalar_select %p22_p1, %s966_s8, %s24_s13  }
   0xb   : > { %p33_p5 = por %p32_p2, %p31_p0  ;;  %p1027_p6 = por %p38_p4, %p37_p3 }
   0xc   : > { %p61_p7 = scmp.eq.s32.totalorder %s1009_s10, 1  ;;  %p67_p8 = scmp.eq.s32.totalorder %s814_s11, 1 }
   0xd   : > { %s1487_s16 = scalar_select %p1027_p6, 1, 0 }
   0xe   : > { %p838_p10 = scmp.lt.s32.totalorder %s970_s9, 2  ;;  %p1034_p11 = por %p61_p7, %p31_p0 }
   0xf   : > { %p1038_p12 = por %p67_p8, %p37_p3  ;;  %s87_s19 = sand.u32 1, %s966_s8  }
  0x10   : > { %s1488_s17 = scalar_select %p1034_p11, 1, 0 }
  0x11   : > { %s1489_s18 = scalar_select %p1038_p12, 1, 0 }
  0x12   : > { %s822_s20 = smul.u32 672, %s87_s19  ;;  %p1044_p13 = pnand %p838_p10, %p33_p5 }
  0x13   : > { %s839_s21 = smul.u32 10752, %s970_s9  ;;  %s1056_s28 = scalar_lea.sflag [#allocation3], %s87_s19 }
  0x14   : > { %s91_s26 = scalar_lea.vmem [#allocation2], %s822_s20  ;;  %p880_p2 = pneg %p1044_p13 }
  0x15   : > { %s1051_s25 = scalar_lea.hbm %s1483_s0, %s839_s21  ;;  %s99_s27 = sshll.u32 %s91_s26, 4  ;;  %s1053_s27 = int_to_ptr.vmem [resolvable:$true] %s99_s27 }
  0x16   : > { %s878_s29 = scalar_lea.hbm %s1051_s25, 10752  ;;  %s883_s3 = scalar_lea.hbm %s1483_s0, 21504 }
  0x17   : > { %p879_p1 = scmp.ne.s32.totalorder %s1051_s25, %s878_s29  ;;  %p884_p5 = scmp.lt.s32.totalorder %s1051_s25, %s1483_s0 }
  0x18   : > { %p885_p7 = scmp.lt.s32.totalorder %s883_s3, %s878_s29 }
  0x19   : > { %p881_p3 = pnand %p880_p2, %p879_p1 }
  0x1a   : > { %p886_p8 = por %p885_p7, %p884_p5 }
  0x1b   : > { %p882_p4 = pneg %p881_p3 }
  0x1d   : > { %p887_p10 = pnand %p886_p8, %p882_p4 }
  0x1f   : > { %890 = shalt.err (!%p887_p10)
}
  0x20   : > { %s891_s11 = scalar_lea.vmem %s1053_s27, 10752  ;;  %s972_s13 = smov [#allocation2]  }
  0x21   : > { %p892_p9 = scmp.ne.s32.totalorder %s1053_s27, %s891_s11  ;;  %s896_s14 = sshll.u32 %s972_s13, 4  ;;  %s897_s14 = int_to_ptr.vmem [resolvable:$false] %s896_s14 }
  0x22   : > { %s898_s19 = scalar_lea.vmem %s897_s14, 21504  ;;  %p899_p3 = scmp.lt.s32.totalorder %s1053_s27, %s897_s14 }
  0x23   : > { %p894_p0 = pnand %p892_p9, %p880_p2  ;;  %p900_p12 = scmp.lt.s32.totalorder %s898_s19, %s891_s11 }
  0x25   : > { %p895_p1 = pneg %p894_p0  ;;  %p901_p11 = por %p900_p12, %p899_p3 }
  0x27   : > { %p902_p6 = pnand %p901_p11, %p895_p1 }
  0x29   : > { %905 = shalt.err (!%p902_p6)
}
  0x2a   : > { %s973_s20 = smov 3584   ;;  %s974_s21 = smov 224  }
  0x2b   : > { %833 = dma.hbm_to_vmem [thread:$0]  (!%p1044_p13), %s1051_s25, 10752, %s1053_s27, %s1056_s28, %s973_s20, %s973_s20, %s974_s21  }
  0x2c   : > { %p107_p9 = scmp.lt.s32.totalorder %s970_s9, 3  ;;  %p1491_p0 = scmp.ge.s32.totalorder %s970_s9, 1 }
  0x2e   : > { %p108_p2 = pnand %p1491_p0, %p107_p9 }
  0x2f   : > { %s1081_s23 = sand.u32 (!%p108_p2), 1, %s962_s7   ;;  %p1492_p6 = scmp.ne.s32.totalorder (!%p108_p2), %s1487_s16, 0 }
  0x30   : > { %111 = sbr.rel (%p108_p2) target bundleno = 180 (0xb4), region = 24  ;;  %s114_s26 = scalar_lea.sflag (!%p108_p2), [#allocation3], %s1081_s23 }
  0x31   : > { %s824_s24 = smul.u32 (!%p108_p2), 672, %s1081_s23 }
  0x33   : > { %s1087_s29 = scalar_lea.vmem (!%p108_p2), [#allocation2], %s824_s24 }
  0x35   : > { %949 = dma.done.wait (%p1492_p6), %s114_s26, 10752  }
  0x36   : > { %951 = vsyncadd (%p1492_p6), %s114_s26, 4294956544  ;;  %v138_v0 = vld [vmem:[%s1087_s29] sm:$0xff]  ;;  %v139_v1 = vld [vmem:[%s1087_s29 + $0x8] sm:$0xff]  ;;  %s1115_s16 = scalar_lea.vmem [#allocation5], %s824_s24  ;;  %s840_s22 = smul.u32 10752, %s1009_s10 }
  0x37   : > { %v140_v2 = vld [vmem:[%s1087_s29 + $0x10] sm:$0xff]  ;;  %v222_v3 = vadd.f32 3.0, %v138_v0  ;;  %v223_v4 = vadd.f32 3.0, %v139_v1  ;;  %v141_v6 = vld [vmem:[%s1087_s29 + $0x18] sm:$0xff]  ;;  %v142_v7 = vld [vmem:[%s1087_s29 + $0x20] sm:$0xff]  ;;  %s741_s25 = sshll.u32 %s1115_s16, 4  ;;  %s1430_s25 = int_to_ptr.vmem [resolvable:$true] %s741_s25 }
  0x38   : > { %v224_v5 = vadd.f32 3.0, %v140_v2  ;;  %v143_v8 = vld [vmem:[%s1087_s29 + $0x28] sm:$0xff]  ;;  %v225_v9 = vadd.f32 3.0, %v141_v6  ;;  %v226_v10 = vadd.f32 3.0, %v142_v7  ;;  %v144_v12 = vld [vmem:[%s1087_s29 + $0x30] sm:$0xff]  ;;  %v145_v13 = vld [vmem:[%s1087_s29 + $0x38] sm:$0xff]  ;;  %s1436_s28 = scalar_lea.hbm %s1484_s1, %s840_s22 }
  0x39   : > { %v227_v11 = vadd.f32 3.0, %v143_v8  ;;  %v306_v14 = vmax.f32 %v222_v3, 0.0  ;;  %v307_v15 = vmax.f32 %v223_v4, 0.0  ;;  %v228_v17 = vadd.f32 3.0, %v144_v12  ;;  %v1102_v30 = vld [vmem:[%s1087_s29 + $0x40] sm:$0xff]  ;;  %v1105_v31 = vld [vmem:[%s1087_s29 + $0x48] sm:$0xff] }
  0x3a   : > { %v308_v16 = vmax.f32 %v224_v5, 0.0  ;;  %v309_v18 = vmax.f32 %v225_v9, 0.0  ;;  %v310_v19 = vmax.f32 %v226_v10, 0.0  ;;  %v229_v21 = vadd.f32 3.0, %v145_v13  ;;  %v1108_v32 = vld [vmem:[%s1087_s29 + $0x50] sm:$0xff]  ;;  %v149_v43 = vld [vmem:[%s1087_s29 + $0x58] sm:$0xff] }
  0x3b   : > { %v311_v20 = vmax.f32 %v227_v11, 0.0  ;;  %v390_v22 = vmin.f32 %v306_v14, 6.0  ;;  %v391_v23 = vmin.f32 %v307_v15, 6.0  ;;  %v312_v25 = vmax.f32 %v228_v17, 0.0  ;;  %v150_v44 = vld [vmem:[%s1087_s29 + $0x60] sm:$0xff]  ;;  %v151_v45 = vld [vmem:[%s1087_s29 + $0x68] sm:$0xff] }
  0x3c   : > { %v392_v24 = vmin.f32 %v308_v16, 6.0  ;;  %v393_v26 = vmin.f32 %v309_v18, 6.0  ;;  %v394_v27 = vmin.f32 %v310_v19, 6.0  ;;  %v313_v29 = vmax.f32 %v229_v21, 0.0  ;;  %v152_v58 = vld [vmem:[%s1087_s29 + $0x70] sm:$0xff]  ;;  %v1128_v63 = vld [vmem:[%s1087_s29 + $0x78] sm:$0xff] }
  0x3d   : > { %v395_v28 = vmin.f32 %v311_v20, 6.0  ;;  %v474_v33 = vmul.f32 0.16666667, %v390_v22  ;;  %v475_v34 = vmul.f32 0.16666667, %v391_v23  ;;  %v396_v42 = vmin.f32 %v312_v25, 6.0 }
  0x3e   : > { %v476_v35 = vmul.f32 0.16666667, %v392_v24  ;;  %v477_v36 = vmul.f32 0.16666667, %v393_v26  ;;  %v478_v37 = vmul.f32 0.16666667, %v394_v27 }
  0x3f   : > { %v479_v38 = vmul.f32 0.16666667, %v395_v28  ;;  %v558_v39 = vmul.f32 %v474_v33, %v138_v0  ;;  %v559_v40 = vmul.f32 %v475_v34, %v139_v1  ;;  %v397_v49 = vmin.f32 %v313_v29, 6.0  ;;  %v1140_v14 = vld [vmem:[%s1087_s29 + $0x90] sm:$0xff]  ;;  %v157_v25 = vld [vmem:[%s1087_s29 + $0x98] sm:$0xff]  ;;  %v158_v26 = vld [vmem:[%s1087_s29 + $0xa0] sm:$0xff] }
  0x40   : > { %v560_v41 = vmul.f32 %v476_v35, %v140_v2  ;;  %v561_v46 = vmul.f32 %v477_v36, %v141_v6  ;;  %v562_v47 = vmul.f32 %v478_v37, %v142_v7  ;;  %v480_v50 = vmul.f32 0.16666667, %v396_v42  ;;  %v159_v27 = vld [vmem:[%s1087_s29 + $0xa8] sm:$0xff]  ;;  %s727_s30 = scalar_lea.sflag [#allocation4], %s1081_s23  ;;  %s906_s2 = scalar_lea.vmem %s1430_s25, 10752 }
  0x41   : > { %v563_v48 = vmul.f32 %v479_v38, %v143_v8  ;;  %642 = vst [vmem:[%s1115_s16] sm:$0xff] %v558_v39  ;;  %643 = vst [vmem:[%s1115_s16 + $0x8] sm:$0xff] %v559_v40  ;;  %v230_v51 = vadd.f32 3.0, %v1102_v30  ;;  %v231_v52 = vadd.f32 3.0, %v1105_v31  ;;  %v232_v53 = vadd.f32 3.0, %v1108_v32  ;;  %p907_p11 = scmp.ne.s32.totalorder %s1430_s25, %s906_s2  ;;  %p1493_p12 = scmp.ne.s32.totalorder %s1488_s17, 0 }
  0x42   : > { %644 = vst [vmem:[%s1115_s16 + $0x10] sm:$0xff] %v560_v41  ;;  %645 = vst [vmem:[%s1115_s16 + $0x18] sm:$0xff] %v561_v46  ;;  %v481_v54 = vmul.f32 0.16666667, %v397_v49  ;;  %v233_v55 = vadd.f32 3.0, %v149_v43  ;;  %v234_v56 = vadd.f32 3.0, %v150_v44  ;;  %v564_v59 = vmul.f32 %v480_v50, %v144_v12 }
  0x43   : > { %646 = vst [vmem:[%s1115_s16 + $0x20] sm:$0xff] %v562_v47  ;;  %647 = vst [vmem:[%s1115_s16 + $0x28] sm:$0xff] %v563_v48  ;;  %v235_v57 = vadd.f32 3.0, %v151_v45  ;;  %v314_v60 = vmax.f32 %v230_v51, 0.0  ;;  %v315_v61 = vmax.f32 %v231_v52, 0.0  ;;  %v316_v62 = vmax.f32 %v232_v53, 0.0  ;;  %p908_p13 = pnand %p907_p11, %p1493_p12 }
  0x44   : > { %v565_v0 = vmul.f32 %v481_v54, %v145_v13  ;;  %v317_v1 = vmax.f32 %v233_v55, 0.0  ;;  %v318_v2 = vmax.f32 %v234_v56, 0.0  ;;  %648 = vst [vmem:[%s1115_s16 + $0x30] sm:$0xff] %v564_v59  ;;  %v236_v7 = vadd.f32 3.0, %v152_v58  ;;  %v1134_v12 = vld [vmem:[%s1087_s29 + $0x80] sm:$0xff]  ;;  %v1137_v13 = vld [vmem:[%s1087_s29 + $0x88] sm:$0xff] }
  0x45   : > { %v319_v3 = vmax.f32 %v235_v57, 0.0  ;;  %v398_v4 = vmin.f32 %v314_v60, 6.0  ;;  %v399_v5 = vmin.f32 %v315_v61, 6.0  ;;  %v400_v6 = vmin.f32 %v316_v62, 6.0  ;;  %v1158_v52 = vld [vmem:[%s1087_s29 + $0xb0] sm:$0xff]  ;;  %v1161_v53 = vld [vmem:[%s1087_s29 + $0xb8] sm:$0xff]  ;;  %p909_p4 = pneg %p908_p13 }
  0x46   : > { %649 = vst [vmem:[%s1115_s16 + $0x38] sm:$0xff] %v565_v0  ;;  %v401_v8 = vmin.f32 %v317_v1, 6.0  ;;  %v402_v9 = vmin.f32 %v318_v2, 6.0  ;;  %v237_v11 = vadd.f32 3.0, %v1128_v63  ;;  %v320_v24 = vmax.f32 %v236_v7, 0.0  ;;  %v1165_v59 = vld [vmem:[%s1087_s29 + $0xc0] sm:$0xff] }
  0x47   : > { %v403_v10 = vmin.f32 %v319_v3, 6.0  ;;  %v482_v15 = vmul.f32 0.16666667, %v398_v4  ;;  %v483_v16 = vmul.f32 0.16666667, %v399_v5  ;;  %v241_v37 = vadd.f32 3.0, %v157_v25 }
  0x48   : > { %v484_v17 = vmul.f32 0.16666667, %v400_v6  ;;  %v485_v18 = vmul.f32 0.16666667, %v401_v8  ;;  %v486_v19 = vmul.f32 0.16666667, %v402_v9 }
  0x49   : > { %v487_v20 = vmul.f32 0.16666667, %v403_v10  ;;  %v566_v21 = vmul.f32 %v482_v15, %v1102_v30  ;;  %v567_v22 = vmul.f32 %v483_v16, %v1105_v31  ;;  %v321_v34 = vmax.f32 %v237_v11, 0.0  ;;  %v1168_v60 = vld [vmem:[%s1087_s29 + $0xc8] sm:$0xff]  ;;  %v165_v7 = vld [vmem:[%s1087_s29 + $0xd8] sm:$0xff]  ;;  %v166_v8 = vld [vmem:[%s1087_s29 + $0xe0] sm:$0xff] }
  0x4a   : > { %v568_v23 = vmul.f32 %v484_v17, %v1108_v32  ;;  %v569_v28 = vmul.f32 %v485_v18, %v149_v43  ;;  %v570_v29 = vmul.f32 %v486_v19, %v150_v44  ;;  %v404_v35 = vmin.f32 %v320_v24, 6.0  ;;  %v167_v9 = vld [vmem:[%s1087_s29 + $0xe8] sm:$0xff]  ;;  %s975_s3 = smov [#allocation5]  }
  0x4b   : > { %v571_v33 = vmul.f32 %v487_v20, %v151_v45  ;;  %650 = vst [vmem:[%s1115_s16 + $0x40] sm:$0xff] %v566_v21  ;;  %651 = vst [vmem:[%s1115_s16 + $0x48] sm:$0xff] %v567_v22  ;;  %v238_v30 = vadd.f32 3.0, %v1134_v12  ;;  %v239_v31 = vadd.f32 3.0, %v1137_v13  ;;  %v240_v32 = vadd.f32 3.0, %v1140_v14  ;;  %s910_s4 = sshll.u32 %s975_s3, 4  ;;  %s911_s4 = int_to_ptr.vmem [resolvable:$false] %s910_s4 }
  0x4c   : > { %652 = vst [vmem:[%s1115_s16 + $0x50] sm:$0xff] %v568_v23  ;;  %653 = vst [vmem:[%s1115_s16 + $0x58] sm:$0xff] %v569_v28  ;;  %v405_v36 = vmin.f32 %v321_v34, 6.0  ;;  %v242_v38 = vadd.f32 3.0, %v158_v26  ;;  %v243_v39 = vadd.f32 3.0, %v159_v27  ;;  %v325_v45 = vmax.f32 %v241_v37, 0.0  ;;  %p913_p5 = scmp.lt.s32.totalorder %s1430_s25, %s911_s4 }
  0x4d   : > { %654 = vst [vmem:[%s1115_s16 + $0x60] sm:$0xff] %v570_v29  ;;  %655 = vst [vmem:[%s1115_s16 + $0x68] sm:$0xff] %v571_v33  ;;  %v488_v40 = vmul.f32 0.16666667, %v404_v35  ;;  %v322_v41 = vmax.f32 %v238_v30, 0.0  ;;  %v323_v42 = vmax.f32 %v239_v31, 0.0 }
  0x4e   : > { %v324_v43 = vmax.f32 %v240_v32, 0.0  ;;  %v489_v44 = vmul.f32 0.16666667, %v405_v36  ;;  %v326_v46 = vmax.f32 %v242_v38, 0.0  ;;  %v327_v47 = vmax.f32 %v243_v39, 0.0  ;;  %v1193_v33 = vld [vmem:[%s1087_s29 + $0xf0] sm:$0xff] }
  0x4f   : > { %v572_v48 = vmul.f32 %v488_v40, %v152_v58  ;;  %v406_v49 = vmin.f32 %v322_v41, 6.0  ;;  %v407_v50 = vmin.f32 %v323_v42, 6.0  ;;  %v409_v55 = vmin.f32 %v325_v45, 6.0  ;;  %v1171_v58 = vld [vmem:[%s1087_s29 + $0xd0] sm:$0xff]  ;;  %v1196_v32 = vld [vmem:[%s1087_s29 + $0xf8] sm:$0xff]  ;;  %v1199_v40 = vld [vmem:[%s1087_s29 + $0x100] sm:$0xff] }
  0x50   : > { %v408_v51 = vmin.f32 %v324_v43, 6.0  ;;  %v573_v54 = vmul.f32 %v489_v44, %v1128_v63  ;;  %v410_v56 = vmin.f32 %v326_v46, 6.0  ;;  %v411_v57 = vmin.f32 %v327_v47, 6.0  ;;  %v1202_v41 = vld [vmem:[%s1087_s29 + $0x108] sm:$0xff]  ;;  %v1205_v42 = vld [vmem:[%s1087_s29 + $0x110] sm:$0xff]  ;;  %s912_s5 = scalar_lea.vmem %s911_s4, 21504 }
  0x51   : > { %656 = vst [vmem:[%s1115_s16 + $0x70] sm:$0xff] %v572_v48  ;;  %v490_v61 = vmul.f32 0.16666667, %v406_v49  ;;  %v491_v62 = vmul.f32 0.16666667, %v407_v50  ;;  %v244_v6 = vadd.f32 3.0, %v1158_v52  ;;  %p914_p7 = scmp.lt.s32.totalorder %s912_s5, %s906_s2 }
  0x52   : > { %v492_v0 = vmul.f32 0.16666667, %v408_v51  ;;  %657 = vst [vmem:[%s1115_s16 + $0x78] sm:$0xff] %v573_v54  ;;  %v493_v63 = vmul.f32 0.16666667, %v409_v55  ;;  %v245_v16 = vadd.f32 3.0, %v1161_v53 }
  0x53   : > { %v494_v1 = vmul.f32 0.16666667, %v410_v56  ;;  %v495_v2 = vmul.f32 0.16666667, %v411_v57  ;;  %v574_v3 = vmul.f32 %v490_v61, %v1134_v12  ;;  %v575_v4 = vmul.f32 %v491_v62, %v1137_v13  ;;  %v173_v56 = vld [vmem:[%s1087_s29 + $0x118] sm:$0xff]  ;;  %v174_v57 = vld [vmem:[%s1087_s29 + $0x120] sm:$0xff]  ;;  %p915_p8 = por %p914_p7, %p913_p5 }
  0x54   : > { %v576_v5 = vmul.f32 %v492_v0, %v1140_v14  ;;  %v577_v10 = vmul.f32 %v493_v63, %v157_v25  ;;  %v328_v12 = vmax.f32 %v244_v6, 0.0  ;;  %v246_v13 = vadd.f32 3.0, %v1165_v59 }
  0x55   : > { %v578_v11 = vmul.f32 %v494_v1, %v158_v26  ;;  %v579_v15 = vmul.f32 %v495_v2, %v159_v27  ;;  %658 = vst [vmem:[%s1115_s16 + $0x80] sm:$0xff] %v574_v3  ;;  %659 = vst [vmem:[%s1115_s16 + $0x88] sm:$0xff] %v575_v4  ;;  %v247_v14 = vadd.f32 3.0, %v1168_v60  ;;  %v248_v17 = vadd.f32 3.0, %v1171_v58  ;;  %p916_p10 = pnand %p915_p8, %p909_p4 }
  0x56   : > { %660 = vst [vmem:[%s1115_s16 + $0x90] sm:$0xff] %v576_v5  ;;  %661 = vst [vmem:[%s1115_s16 + $0x98] sm:$0xff] %v577_v10  ;;  %v329_v18 = vmax.f32 %v245_v16, 0.0  ;;  %v249_v19 = vadd.f32 3.0, %v165_v7  ;;  %v250_v20 = vadd.f32 3.0, %v166_v8  ;;  %v251_v21 = vadd.f32 3.0, %v167_v9 }
  0x57   : > { %662 = vst [vmem:[%s1115_s16 + $0xa0] sm:$0xff] %v578_v11  ;;  %663 = vst [vmem:[%s1115_s16 + $0xa8] sm:$0xff] %v579_v15  ;;  %v412_v22 = vmin.f32 %v328_v12, 6.0  ;;  %v330_v23 = vmax.f32 %v246_v13, 0.0  ;;  %v331_v24 = vmax.f32 %v247_v14, 0.0  ;;  %v332_v25 = vmax.f32 %v248_v17, 0.0 }
  0x58   : > { %v413_v26 = vmin.f32 %v329_v18, 6.0  ;;  %v333_v27 = vmax.f32 %v249_v19, 0.0  ;;  %v334_v28 = vmax.f32 %v250_v20, 0.0  ;;  %v335_v29 = vmax.f32 %v251_v21, 0.0  ;;  %v1229_v12 = vld [vmem:[%s1087_s29 + $0x130] sm:$0xff]  ;;  %v1232_v19 = vld [vmem:[%s1087_s29 + $0x138] sm:$0xff] }
  0x59   : > { %v496_v34 = vmul.f32 0.16666667, %v412_v22  ;;  %v414_v35 = vmin.f32 %v330_v23, 6.0  ;;  %v415_v30 = vmin.f32 %v331_v24, 6.0  ;;  %v416_v31 = vmin.f32 %v332_v25, 6.0  ;;  %v1235_v24 = vld [vmem:[%s1087_s29 + $0x140] sm:$0xff] }
  0x5a   : > { %v497_v36 = vmul.f32 0.16666667, %v413_v26  ;;  %v417_v37 = vmin.f32 %v333_v27, 6.0  ;;  %v418_v38 = vmin.f32 %v334_v28, 6.0  ;;  %v419_v39 = vmin.f32 %v335_v29, 6.0  ;;  %v1238_v25 = vld [vmem:[%s1087_s29 + $0x148] sm:$0xff] }
  0x5b   : > { %v580_v43 = vmul.f32 %v496_v34, %v1158_v52  ;;  %v498_v44 = vmul.f32 0.16666667, %v414_v35  ;;  %v499_v45 = vmul.f32 0.16666667, %v415_v30  ;;  %v500_v46 = vmul.f32 0.16666667, %v416_v31 }
  0x5c   : > { %v581_v47 = vmul.f32 %v497_v36, %v1161_v53  ;;  %v501_v48 = vmul.f32 0.16666667, %v417_v37  ;;  %v502_v49 = vmul.f32 0.16666667, %v418_v38  ;;  %v503_v50 = vmul.f32 0.16666667, %v419_v39 }
  0x5d   : > { %664 = vst [vmem:[%s1115_s16 + $0xb0] sm:$0xff] %v580_v43  ;;  %v582_v51 = vmul.f32 %v498_v44, %v1165_v59  ;;  %v583_v54 = vmul.f32 %v499_v45, %v1168_v60  ;;  %v584_v55 = vmul.f32 %v500_v46, %v1171_v58  ;;  %v252_v52 = vadd.f32 3.0, %v1193_v33  ;;  %v175_v53 = vld [vmem:[%s1087_s29 + $0x128] sm:$0xff]  ;;  %v1241_v26 = vld [vmem:[%s1087_s29 + $0x150] sm:$0xff]  ;;  %v181_v43 = vld [vmem:[%s1087_s29 + $0x158] sm:$0xff] }
  0x5e   : > { %665 = vst [vmem:[%s1115_s16 + $0xb8] sm:$0xff] %v581_v47  ;;  %v585_v61 = vmul.f32 %v501_v48, %v165_v7  ;;  %v586_v62 = vmul.f32 %v502_v49, %v166_v8  ;;  %v587_v0 = vmul.f32 %v503_v50, %v167_v9  ;;  %v253_v63 = vadd.f32 3.0, %v1196_v32  ;;  %v182_v44 = vld [vmem:[%s1087_s29 + $0x160] sm:$0xff] }
  0x5f   : > { %666 = vst [vmem:[%s1115_s16 + $0xc0] sm:$0xff] %v582_v51  ;;  %667 = vst [vmem:[%s1115_s16 + $0xc8] sm:$0xff] %v583_v54  ;;  %v336_v59 = vmax.f32 %v252_v52, 0.0  ;;  %v254_v60 = vadd.f32 3.0, %v1199_v40  ;;  %v255_v58 = vadd.f32 3.0, %v1202_v41  ;;  %v256_v1 = vadd.f32 3.0, %v1205_v42 }
  0x60   : > { %668 = vst [vmem:[%s1115_s16 + $0xd0] sm:$0xff] %v584_v55  ;;  %669 = vst [vmem:[%s1115_s16 + $0xd8] sm:$0xff] %v585_v61  ;;  %v337_v2 = vmax.f32 %v253_v63, 0.0  ;;  %v257_v3 = vadd.f32 3.0, %v173_v56  ;;  %v258_v4 = vadd.f32 3.0, %v174_v57  ;;  %v259_v5 = vadd.f32 3.0, %v175_v53 }
  0x61   : > { %670 = vst [vmem:[%s1115_s16 + $0xe0] sm:$0xff] %v586_v62  ;;  %671 = vst [vmem:[%s1115_s16 + $0xe8] sm:$0xff] %v587_v0  ;;  %v420_v6 = vmin.f32 %v336_v59, 6.0  ;;  %v338_v7 = vmax.f32 %v254_v60, 0.0  ;;  %v339_v8 = vmax.f32 %v255_v58, 0.0  ;;  %v340_v9 = vmax.f32 %v256_v1, 0.0 }
  0x62   : > { %v421_v10 = vmin.f32 %v337_v2, 6.0  ;;  %v341_v11 = vmax.f32 %v257_v3, 0.0  ;;  %v342_v15 = vmax.f32 %v258_v4, 0.0  ;;  %v343_v16 = vmax.f32 %v259_v5, 0.0  ;;  %v1265_v59 = vld [vmem:[%s1087_s29 + $0x170] sm:$0xff]  ;;  %v1268_v3 = vld [vmem:[%s1087_s29 + $0x178] sm:$0xff] }
  0x63   : > { %v504_v13 = vmul.f32 0.16666667, %v420_v6  ;;  %v422_v14 = vmin.f32 %v338_v7, 6.0  ;;  %v423_v17 = vmin.f32 %v339_v8, 6.0  ;;  %v424_v18 = vmin.f32 %v340_v9, 6.0  ;;  %v1271_v8 = vld [vmem:[%s1087_s29 + $0x180] sm:$0xff] }
  0x64   : > { %v505_v20 = vmul.f32 0.16666667, %v421_v10  ;;  %v425_v21 = vmin.f32 %v341_v11, 6.0  ;;  %v426_v22 = vmin.f32 %v342_v15, 6.0  ;;  %v427_v23 = vmin.f32 %v343_v16, 6.0  ;;  %v1274_v9 = vld [vmem:[%s1087_s29 + $0x188] sm:$0xff] }
  0x65   : > { %v588_v27 = vmul.f32 %v504_v13, %v1193_v33  ;;  %v506_v28 = vmul.f32 0.16666667, %v422_v14  ;;  %v507_v29 = vmul.f32 0.16666667, %v423_v17  ;;  %v508_v34 = vmul.f32 0.16666667, %v424_v18 }
  0x66   : > { %v589_v35 = vmul.f32 %v505_v20, %v1196_v32  ;;  %v509_v30 = vmul.f32 0.16666667, %v425_v21  ;;  %v510_v31 = vmul.f32 0.16666667, %v426_v22  ;;  %v511_v36 = vmul.f32 0.16666667, %v427_v23 }
  0x67   : > { %672 = vst [vmem:[%s1115_s16 + $0xf0] sm:$0xff] %v588_v27  ;;  %v590_v37 = vmul.f32 %v506_v28, %v1199_v40  ;;  %v591_v38 = vmul.f32 %v507_v29, %v1202_v41  ;;  %v592_v39 = vmul.f32 %v508_v34, %v1205_v42  ;;  %v260_v33 = vadd.f32 3.0, %v1229_v12  ;;  %v183_v32 = vld [vmem:[%s1087_s29 + $0x168] sm:$0xff]  ;;  %v1277_v10 = vld [vmem:[%s1087_s29 + $0x190] sm:$0xff]  ;;  %v189_v27 = vld [vmem:[%s1087_s29 + $0x198] sm:$0xff] }
  0x68   : > { %673 = vst [vmem:[%s1115_s16 + $0xf8] sm:$0xff] %v589_v35  ;;  %v593_v45 = vmul.f32 %v509_v30, %v173_v56  ;;  %v594_v46 = vmul.f32 %v510_v31, %v174_v57  ;;  %v595_v47 = vmul.f32 %v511_v36, %v175_v53  ;;  %v261_v48 = vadd.f32 3.0, %v1232_v19  ;;  %v190_v28 = vld [vmem:[%s1087_s29 + $0x1a0] sm:$0xff] }
  0x69   : > { %674 = vst [vmem:[%s1115_s16 + $0x100] sm:$0xff] %v590_v37  ;;  %675 = vst [vmem:[%s1115_s16 + $0x108] sm:$0xff] %v591_v38  ;;  %v344_v40 = vmax.f32 %v260_v33, 0.0  ;;  %v262_v41 = vadd.f32 3.0, %v1235_v24  ;;  %v263_v42 = vadd.f32 3.0, %v1238_v25  ;;  %v264_v49 = vadd.f32 3.0, %v1241_v26 }
  0x6a   : > { %676 = vst [vmem:[%s1115_s16 + $0x110] sm:$0xff] %v592_v39  ;;  %677 = vst [vmem:[%s1115_s16 + $0x118] sm:$0xff] %v593_v45  ;;  %v345_v50 = vmax.f32 %v261_v48, 0.0  ;;  %v265_v51 = vadd.f32 3.0, %v181_v43  ;;  %v266_v54 = vadd.f32 3.0, %v182_v44  ;;  %v267_v55 = vadd.f32 3.0, %v183_v32 }
  0x6b   : > { %678 = vst [vmem:[%s1115_s16 + $0x120] sm:$0xff] %v594_v46  ;;  %679 = vst [vmem:[%s1115_s16 + $0x128] sm:$0xff] %v595_v47  ;;  %v428_v52 = vmin.f32 %v344_v40, 6.0  ;;  %v346_v56 = vmax.f32 %v262_v41, 0.0  ;;  %v347_v57 = vmax.f32 %v263_v42, 0.0  ;;  %v348_v53 = vmax.f32 %v264_v49, 0.0 }
  0x6c   : > { %v429_v61 = vmin.f32 %v345_v50, 6.0  ;;  %v349_v62 = vmax.f32 %v265_v51, 0.0  ;;  %v350_v0 = vmax.f32 %v266_v54, 0.0  ;;  %v351_v63 = vmax.f32 %v267_v55, 0.0  ;;  %v1301_v40 = vld [vmem:[%s1087_s29 + $0x1b0] sm:$0xff]  ;;  %v1304_v51 = vld [vmem:[%s1087_s29 + $0x1b8] sm:$0xff] }
  0x6d   : > { %v512_v60 = vmul.f32 0.16666667, %v428_v52  ;;  %v430_v58 = vmin.f32 %v346_v56, 6.0  ;;  %v431_v1 = vmin.f32 %v347_v57, 6.0  ;;  %v432_v2 = vmin.f32 %v348_v53, 6.0  ;;  %v1307_v57 = vld [vmem:[%s1087_s29 + $0x1c0] sm:$0xff] }
  0x6e   : > { %v513_v4 = vmul.f32 0.16666667, %v429_v61  ;;  %v433_v5 = vmin.f32 %v349_v62, 6.0  ;;  %v434_v6 = vmin.f32 %v350_v0, 6.0  ;;  %v435_v7 = vmin.f32 %v351_v63, 6.0  ;;  %v1310_v53 = vld [vmem:[%s1087_s29 + $0x1c8] sm:$0xff] }
  0x6f   : > { %v596_v11 = vmul.f32 %v512_v60, %v1229_v12  ;;  %v514_v15 = vmul.f32 0.16666667, %v430_v58  ;;  %v515_v16 = vmul.f32 0.16666667, %v431_v1  ;;  %v516_v13 = vmul.f32 0.16666667, %v432_v2 }
  0x70   : > { %v597_v14 = vmul.f32 %v513_v4, %v1232_v19  ;;  %v517_v17 = vmul.f32 0.16666667, %v433_v5  ;;  %v518_v18 = vmul.f32 0.16666667, %v434_v6  ;;  %v519_v20 = vmul.f32 0.16666667, %v435_v7 }
  0x71   : > { %680 = vst [vmem:[%s1115_s16 + $0x130] sm:$0xff] %v596_v11  ;;  %v598_v21 = vmul.f32 %v514_v15, %v1235_v24  ;;  %v599_v22 = vmul.f32 %v515_v16, %v1238_v25  ;;  %v600_v23 = vmul.f32 %v516_v13, %v1241_v26  ;;  %v268_v12 = vadd.f32 3.0, %v1265_v59  ;;  %v191_v19 = vld [vmem:[%s1087_s29 + $0x1a8] sm:$0xff]  ;;  %v1313_v61 = vld [vmem:[%s1087_s29 + $0x1d0] sm:$0xff]  ;;  %v197_v11 = vld [vmem:[%s1087_s29 + $0x1d8] sm:$0xff] }
  0x72   : > { %681 = vst [vmem:[%s1115_s16 + $0x138] sm:$0xff] %v597_v14  ;;  %v601_v29 = vmul.f32 %v517_v17, %v181_v43  ;;  %v602_v34 = vmul.f32 %v518_v18, %v182_v44  ;;  %v603_v35 = vmul.f32 %v519_v20, %v183_v32  ;;  %v269_v30 = vadd.f32 3.0, %v1268_v3  ;;  %v198_v15 = vld [vmem:[%s1087_s29 + $0x1e0] sm:$0xff] }
  0x73   : > { %682 = vst [vmem:[%s1115_s16 + $0x140] sm:$0xff] %v598_v21  ;;  %683 = vst [vmem:[%s1115_s16 + $0x148] sm:$0xff] %v599_v22  ;;  %v352_v24 = vmax.f32 %v268_v12, 0.0  ;;  %v270_v25 = vadd.f32 3.0, %v1271_v8  ;;  %v271_v26 = vadd.f32 3.0, %v1274_v9  ;;  %v272_v31 = vadd.f32 3.0, %v1277_v10 }
  0x74   : > { %684 = vst [vmem:[%s1115_s16 + $0x150] sm:$0xff] %v600_v23  ;;  %685 = vst [vmem:[%s1115_s16 + $0x158] sm:$0xff] %v601_v29  ;;  %v353_v36 = vmax.f32 %v269_v30, 0.0  ;;  %v273_v37 = vadd.f32 3.0, %v189_v27  ;;  %v274_v38 = vadd.f32 3.0, %v190_v28  ;;  %v275_v39 = vadd.f32 3.0, %v191_v19 }
  0x75   : > { %686 = vst [vmem:[%s1115_s16 + $0x160] sm:$0xff] %v602_v34  ;;  %687 = vst [vmem:[%s1115_s16 + $0x168] sm:$0xff] %v603_v35  ;;  %v436_v33 = vmin.f32 %v352_v24, 6.0  ;;  %v354_v43 = vmax.f32 %v270_v25, 0.0  ;;  %v355_v44 = vmax.f32 %v271_v26, 0.0  ;;  %v356_v32 = vmax.f32 %v272_v31, 0.0 }
  0x76   : > { %v437_v45 = vmin.f32 %v353_v36, 6.0  ;;  %v357_v46 = vmax.f32 %v273_v37, 0.0  ;;  %v358_v47 = vmax.f32 %v274_v38, 0.0  ;;  %v359_v48 = vmax.f32 %v275_v39, 0.0  ;;  %v1337_v24 = vld [vmem:[%s1087_s29 + $0x1f0] sm:$0xff]  ;;  %v1340_v37 = vld [vmem:[%s1087_s29 + $0x1f8] sm:$0xff] }
  0x77   : > { %v520_v41 = vmul.f32 0.16666667, %v436_v33  ;;  %v438_v42 = vmin.f32 %v354_v43, 6.0  ;;  %v439_v49 = vmin.f32 %v355_v44, 6.0  ;;  %v440_v50 = vmin.f32 %v356_v32, 6.0  ;;  %v1343_v44 = vld [vmem:[%s1087_s29 + $0x200] sm:$0xff] }
  0x78   : > { %v521_v54 = vmul.f32 0.16666667, %v437_v45  ;;  %v441_v55 = vmin.f32 %v357_v46, 6.0  ;;  %v442_v52 = vmin.f32 %v358_v47, 6.0  ;;  %v443_v56 = vmin.f32 %v359_v48, 6.0  ;;  %v1346_v32 = vld [vmem:[%s1087_s29 + $0x208] sm:$0xff] }
  0x79   : > { %v604_v62 = vmul.f32 %v520_v41, %v1265_v59  ;;  %v522_v0 = vmul.f32 0.16666667, %v438_v42  ;;  %v523_v63 = vmul.f32 0.16666667, %v439_v49  ;;  %v524_v60 = vmul.f32 0.16666667, %v440_v50 }
  0x7a   : > { %v605_v58 = vmul.f32 %v521_v54, %v1268_v3  ;;  %v525_v1 = vmul.f32 0.16666667, %v441_v55  ;;  %v526_v2 = vmul.f32 0.16666667, %v442_v52  ;;  %v527_v4 = vmul.f32 0.16666667, %v443_v56 }
  0x7b   : > { %688 = vst [vmem:[%s1115_s16 + $0x170] sm:$0xff] %v604_v62  ;;  %v606_v5 = vmul.f32 %v522_v0, %v1271_v8  ;;  %v607_v6 = vmul.f32 %v523_v63, %v1274_v9  ;;  %v608_v7 = vmul.f32 %v524_v60, %v1277_v10  ;;  %v276_v59 = vadd.f32 3.0, %v1301_v40  ;;  %v199_v3 = vld [vmem:[%s1087_s29 + $0x1e8] sm:$0xff]  ;;  %v1349_v45 = vld [vmem:[%s1087_s29 + $0x210] sm:$0xff]  ;;  %v205_v62 = vld [vmem:[%s1087_s29 + $0x218] sm:$0xff] }
  0x7c   : > { %689 = vst [vmem:[%s1115_s16 + $0x178] sm:$0xff] %v605_v58  ;;  %v609_v16 = vmul.f32 %v525_v1, %v189_v27  ;;  %v610_v13 = vmul.f32 %v526_v2, %v190_v28  ;;  %v611_v14 = vmul.f32 %v527_v4, %v191_v19  ;;  %v277_v17 = vadd.f32 3.0, %v1304_v51  ;;  %v206_v0 = vld [vmem:[%s1087_s29 + $0x220] sm:$0xff] }
  0x7d   : > { %690 = vst [vmem:[%s1115_s16 + $0x180] sm:$0xff] %v606_v5  ;;  %691 = vst [vmem:[%s1115_s16 + $0x188] sm:$0xff] %v607_v6  ;;  %v360_v8 = vmax.f32 %v276_v59, 0.0  ;;  %v278_v9 = vadd.f32 3.0, %v1307_v57  ;;  %v279_v10 = vadd.f32 3.0, %v1310_v53  ;;  %v280_v18 = vadd.f32 3.0, %v1313_v61 }
  0x7e   : > { %692 = vst [vmem:[%s1115_s16 + $0x190] sm:$0xff] %v608_v7  ;;  %693 = vst [vmem:[%s1115_s16 + $0x198] sm:$0xff] %v609_v16  ;;  %v361_v20 = vmax.f32 %v277_v17, 0.0  ;;  %v281_v21 = vadd.f32 3.0, %v197_v11  ;;  %v282_v22 = vadd.f32 3.0, %v198_v15  ;;  %v283_v23 = vadd.f32 3.0, %v199_v3 }
  0x7f   : > { %694 = vst [vmem:[%s1115_s16 + $0x1a0] sm:$0xff] %v610_v13  ;;  %695 = vst [vmem:[%s1115_s16 + $0x1a8] sm:$0xff] %v611_v14  ;;  %v444_v12 = vmin.f32 %v360_v8, 6.0  ;;  %v362_v27 = vmax.f32 %v278_v9, 0.0  ;;  %v363_v28 = vmax.f32 %v279_v10, 0.0  ;;  %v364_v19 = vmax.f32 %v280_v18, 0.0 }
  0x80   : > { %v445_v29 = vmin.f32 %v361_v20, 6.0  ;;  %v365_v34 = vmax.f32 %v281_v21, 0.0  ;;  %v366_v35 = vmax.f32 %v282_v22, 0.0  ;;  %v367_v30 = vmax.f32 %v283_v23, 0.0  ;;  %v1373_v8 = vld [vmem:[%s1087_s29 + $0x230] sm:$0xff]  ;;  %v1376_v21 = vld [vmem:[%s1087_s29 + $0x238] sm:$0xff] }
  0x81   : > { %v528_v25 = vmul.f32 0.16666667, %v444_v12  ;;  %v446_v26 = vmin.f32 %v362_v27, 6.0  ;;  %v447_v31 = vmin.f32 %v363_v28, 6.0  ;;  %v448_v36 = vmin.f32 %v364_v19, 6.0  ;;  %v1379_v28 = vld [vmem:[%s1087_s29 + $0x240] sm:$0xff] }
  0x82   : > { %v529_v38 = vmul.f32 0.16666667, %v445_v29  ;;  %v449_v39 = vmin.f32 %v365_v34, 6.0  ;;  %v450_v33 = vmin.f32 %v366_v35, 6.0  ;;  %v451_v43 = vmin.f32 %v367_v30, 6.0  ;;  %v1382_v19 = vld [vmem:[%s1087_s29 + $0x248] sm:$0xff] }
  0x83   : > { %v612_v46 = vmul.f32 %v528_v25, %v1301_v40  ;;  %v530_v47 = vmul.f32 0.16666667, %v446_v26  ;;  %v531_v48 = vmul.f32 0.16666667, %v447_v31  ;;  %v532_v41 = vmul.f32 0.16666667, %v448_v36 }
  0x84   : > { %v613_v42 = vmul.f32 %v529_v38, %v1304_v51  ;;  %v533_v49 = vmul.f32 0.16666667, %v449_v39  ;;  %v534_v50 = vmul.f32 0.16666667, %v450_v33  ;;  %v535_v54 = vmul.f32 0.16666667, %v451_v43 }
  0x85   : > { %696 = vst [vmem:[%s1115_s16 + $0x1b0] sm:$0xff] %v612_v46  ;;  %v614_v55 = vmul.f32 %v530_v47, %v1307_v57  ;;  %v615_v52 = vmul.f32 %v531_v48, %v1310_v53  ;;  %v616_v56 = vmul.f32 %v532_v41, %v1313_v61  ;;  %v284_v40 = vadd.f32 3.0, %v1337_v24  ;;  %v207_v51 = vld [vmem:[%s1087_s29 + $0x228] sm:$0xff]  ;;  %v1385_v29 = vld [vmem:[%s1087_s29 + $0x250] sm:$0xff]  ;;  %v213_v46 = vld [vmem:[%s1087_s29 + $0x258] sm:$0xff] }
  0x86   : > { %697 = vst [vmem:[%s1115_s16 + $0x1b8] sm:$0xff] %v613_v42  ;;  %v617_v63 = vmul.f32 %v533_v49, %v197_v11  ;;  %v618_v60 = vmul.f32 %v534_v50, %v198_v15  ;;  %v619_v58 = vmul.f32 %v535_v54, %v199_v3  ;;  %v285_v1 = vadd.f32 3.0, %v1340_v37  ;;  %v214_v47 = vld [vmem:[%s1087_s29 + $0x260] sm:$0xff] }
  0x87   : > { %698 = vst [vmem:[%s1115_s16 + $0x1c0] sm:$0xff] %v614_v55  ;;  %699 = vst [vmem:[%s1115_s16 + $0x1c8] sm:$0xff] %v615_v52  ;;  %v368_v57 = vmax.f32 %v284_v40, 0.0  ;;  %v286_v53 = vadd.f32 3.0, %v1343_v44  ;;  %v287_v61 = vadd.f32 3.0, %v1346_v32  ;;  %v288_v2 = vadd.f32 3.0, %v1349_v45 }
  0x88   : > { %700 = vst [vmem:[%s1115_s16 + $0x1d0] sm:$0xff] %v616_v56  ;;  %701 = vst [vmem:[%s1115_s16 + $0x1d8] sm:$0xff] %v617_v63  ;;  %v369_v4 = vmax.f32 %v285_v1, 0.0  ;;  %v289_v5 = vadd.f32 3.0, %v205_v62  ;;  %v290_v6 = vadd.f32 3.0, %v206_v0  ;;  %v291_v7 = vadd.f32 3.0, %v207_v51 }
  0x89   : > { %702 = vst [vmem:[%s1115_s16 + $0x1e0] sm:$0xff] %v618_v60  ;;  %703 = vst [vmem:[%s1115_s16 + $0x1e8] sm:$0xff] %v619_v58  ;;  %v452_v59 = vmin.f32 %v368_v57, 6.0  ;;  %v370_v11 = vmax.f32 %v286_v53, 0.0  ;;  %v371_v15 = vmax.f32 %v287_v61, 0.0  ;;  %v372_v3 = vmax.f32 %v288_v2, 0.0 }
  0x8a   : > { %v453_v16 = vmin.f32 %v369_v4, 6.0  ;;  %v373_v13 = vmax.f32 %v289_v5, 0.0  ;;  %v374_v14 = vmax.f32 %v290_v6, 0.0  ;;  %v375_v17 = vmax.f32 %v291_v7, 0.0  ;;  %v216_v57 = vld [vmem:[%s1087_s29 + $0x270] sm:$0xff]  ;;  %v217_v5 = vld [vmem:[%s1087_s29 + $0x278] sm:$0xff] }
  0x8b   : > { %v536_v9 = vmul.f32 0.16666667, %v452_v59  ;;  %v454_v10 = vmin.f32 %v370_v11, 6.0  ;;  %v455_v18 = vmin.f32 %v371_v15, 6.0  ;;  %v456_v20 = vmin.f32 %v372_v3, 6.0  ;;  %v218_v15 = vld [vmem:[%s1087_s29 + $0x280] sm:$0xff] }
  0x8c   : > { %v537_v22 = vmul.f32 0.16666667, %v453_v16  ;;  %v457_v23 = vmin.f32 %v373_v13, 6.0  ;;  %v458_v12 = vmin.f32 %v374_v14, 6.0  ;;  %v459_v27 = vmin.f32 %v375_v17, 6.0  ;;  %v219_v3 = vld [vmem:[%s1087_s29 + $0x288] sm:$0xff] }
  0x8d   : > { %v620_v34 = vmul.f32 %v536_v9, %v1337_v24  ;;  %v538_v35 = vmul.f32 0.16666667, %v454_v10  ;;  %v539_v30 = vmul.f32 0.16666667, %v455_v18  ;;  %v540_v25 = vmul.f32 0.16666667, %v456_v20 }
  0x8e   : > { %v621_v26 = vmul.f32 %v537_v22, %v1340_v37  ;;  %v541_v31 = vmul.f32 0.16666667, %v457_v23  ;;  %v542_v36 = vmul.f32 0.16666667, %v458_v12  ;;  %v543_v38 = vmul.f32 0.16666667, %v459_v27 }
  0x8f   : > { %704 = vst [vmem:[%s1115_s16 + $0x1f0] sm:$0xff] %v620_v34  ;;  %v622_v39 = vmul.f32 %v538_v35, %v1343_v44  ;;  %v623_v33 = vmul.f32 %v539_v30, %v1346_v32  ;;  %v624_v43 = vmul.f32 %v540_v25, %v1349_v45  ;;  %v292_v24 = vadd.f32 3.0, %v1373_v8  ;;  %v215_v37 = vld [vmem:[%s1087_s29 + $0x268] sm:$0xff]  ;;  %v220_v16 = vld [vmem:[%s1087_s29 + $0x290] sm:$0xff]  ;;  %v221_v34 = vld [vmem:[%s1087_s29 + $0x298] sm:$0xff] }
  0x90   : > { %705 = vst [vmem:[%s1115_s16 + $0x1f8] sm:$0xff] %v621_v26  ;;  %v625_v48 = vmul.f32 %v541_v31, %v205_v62  ;;  %v626_v41 = vmul.f32 %v542_v36, %v206_v0  ;;  %v627_v42 = vmul.f32 %v543_v38, %v207_v51  ;;  %v293_v49 = vadd.f32 3.0, %v1376_v21 }
  0x91   : > { %706 = vst [vmem:[%s1115_s16 + $0x200] sm:$0xff] %v622_v39  ;;  %707 = vst [vmem:[%s1115_s16 + $0x208] sm:$0xff] %v623_v33  ;;  %v376_v44 = vmax.f32 %v292_v24, 0.0  ;;  %v294_v32 = vadd.f32 3.0, %v1379_v28  ;;  %v295_v45 = vadd.f32 3.0, %v1382_v19  ;;  %v296_v50 = vadd.f32 3.0, %v1385_v29 }
  0x92   : > { %708 = vst [vmem:[%s1115_s16 + $0x210] sm:$0xff] %v624_v43  ;;  %709 = vst [vmem:[%s1115_s16 + $0x218] sm:$0xff] %v625_v48  ;;  %v377_v54 = vmax.f32 %v293_v49, 0.0  ;;  %v297_v55 = vadd.f32 3.0, %v213_v46  ;;  %v298_v52 = vadd.f32 3.0, %v214_v47  ;;  %v299_v56 = vadd.f32 3.0, %v215_v37 }
  0x93   : > { %710 = vst [vmem:[%s1115_s16 + $0x220] sm:$0xff] %v626_v41  ;;  %711 = vst [vmem:[%s1115_s16 + $0x228] sm:$0xff] %v627_v42  ;;  %v460_v40 = vmin.f32 %v376_v44, 6.0  ;;  %v378_v62 = vmax.f32 %v294_v32, 0.0  ;;  %v379_v0 = vmax.f32 %v295_v45, 0.0  ;;  %v380_v51 = vmax.f32 %v296_v50, 0.0 }
  0x94   : > { %v461_v63 = vmin.f32 %v377_v54, 6.0  ;;  %v381_v60 = vmax.f32 %v297_v55, 0.0  ;;  %v382_v58 = vmax.f32 %v298_v52, 0.0  ;;  %v383_v1 = vmax.f32 %v299_v56, 0.0 }
  0x95   : > { %v544_v53 = vmul.f32 0.16666667, %v460_v40  ;;  %v462_v61 = vmin.f32 %v378_v62, 6.0  ;;  %v463_v2 = vmin.f32 %v379_v0, 6.0  ;;  %v464_v4 = vmin.f32 %v380_v51, 6.0 }
  0x96   : > { %v545_v6 = vmul.f32 0.16666667, %v461_v63  ;;  %v465_v7 = vmin.f32 %v381_v60, 6.0  ;;  %v466_v59 = vmin.f32 %v382_v58, 6.0  ;;  %v467_v11 = vmin.f32 %v383_v1, 6.0 }
  0x97   : > { %v628_v13 = vmul.f32 %v544_v53, %v1373_v8  ;;  %v546_v14 = vmul.f32 0.16666667, %v462_v61  ;;  %v547_v17 = vmul.f32 0.16666667, %v463_v2  ;;  %v548_v9 = vmul.f32 0.16666667, %v464_v4 }
  0x98   : > { %v629_v10 = vmul.f32 %v545_v6, %v1376_v21  ;;  %v549_v18 = vmul.f32 0.16666667, %v465_v7  ;;  %v550_v20 = vmul.f32 0.16666667, %v466_v59  ;;  %v551_v22 = vmul.f32 0.16666667, %v467_v11 }
  0x99   : > { %712 = vst [vmem:[%s1115_s16 + $0x230] sm:$0xff] %v628_v13  ;;  %v630_v23 = vmul.f32 %v546_v14, %v1379_v28  ;;  %v631_v12 = vmul.f32 %v547_v17, %v1382_v19  ;;  %v632_v27 = vmul.f32 %v548_v9, %v1385_v29  ;;  %v300_v8 = vadd.f32 3.0, %v216_v57 }
  0x9a   : > { %713 = vst [vmem:[%s1115_s16 + $0x238] sm:$0xff] %v629_v10  ;;  %v633_v35 = vmul.f32 %v549_v18, %v213_v46  ;;  %v634_v21 = vmul.f32 %v550_v20, %v214_v47  ;;  %v635_v30 = vmul.f32 %v551_v22, %v215_v37  ;;  %v301_v25 = vadd.f32 3.0, %v217_v5 }
  0x9b   : > { %714 = vst [vmem:[%s1115_s16 + $0x240] sm:$0xff] %v630_v23  ;;  %715 = vst [vmem:[%s1115_s16 + $0x248] sm:$0xff] %v631_v12  ;;  %v384_v26 = vmax.f32 %v300_v8, 0.0  ;;  %v302_v31 = vadd.f32 3.0, %v218_v15  ;;  %v303_v28 = vadd.f32 3.0, %v219_v3  ;;  %v304_v36 = vadd.f32 3.0, %v220_v16 }
  0x9c   : > { %716 = vst [vmem:[%s1115_s16 + $0x250] sm:$0xff] %v632_v27  ;;  %717 = vst [vmem:[%s1115_s16 + $0x258] sm:$0xff] %v633_v35  ;;  %v385_v19 = vmax.f32 %v301_v25, 0.0  ;;  %v305_v29 = vadd.f32 3.0, %v221_v34 }
  0x9d   : > { %718 = vst [vmem:[%s1115_s16 + $0x260] sm:$0xff] %v634_v21  ;;  %719 = vst [vmem:[%s1115_s16 + $0x268] sm:$0xff] %v635_v30  ;;  %v468_v38 = vmin.f32 %v384_v26, 6.0  ;;  %v386_v39 = vmax.f32 %v302_v31, 0.0  ;;  %v387_v33 = vmax.f32 %v303_v28, 0.0  ;;  %v388_v43 = vmax.f32 %v304_v36, 0.0 }
  0x9e   : > { %v469_v24 = vmin.f32 %v385_v19, 6.0  ;;  %v389_v46 = vmax.f32 %v305_v29, 0.0 }
  0x9f   : > { %v552_v47 = vmul.f32 0.16666667, %v468_v38  ;;  %v470_v37 = vmin.f32 %v386_v39, 6.0  ;;  %v471_v48 = vmin.f32 %v387_v33, 6.0  ;;  %v472_v41 = vmin.f32 %v388_v43, 6.0 }
  0xa0   : > { %v553_v42 = vmul.f32 0.16666667, %v469_v24  ;;  %v473_v49 = vmin.f32 %v389_v46, 6.0 }
  0xa1   : > { %v636_v44 = vmul.f32 %v552_v47, %v216_v57  ;;  %v554_v32 = vmul.f32 0.16666667, %v470_v37  ;;  %v555_v45 = vmul.f32 0.16666667, %v471_v48  ;;  %v556_v50 = vmul.f32 0.16666667, %v472_v41 }
  0xa2   : > { %v637_v54 = vmul.f32 %v553_v42, %v217_v5  ;;  %v557_v55 = vmul.f32 0.16666667, %v473_v49 }
  0xa3   : > { %720 = vst [vmem:[%s1115_s16 + $0x270] sm:$0xff] %v636_v44  ;;  %v638_v52 = vmul.f32 %v554_v32, %v218_v15  ;;  %v639_v56 = vmul.f32 %v555_v45, %v219_v3  ;;  %v640_v40 = vmul.f32 %v556_v50, %v220_v16 }
  0xa4   : > { %721 = vst [vmem:[%s1115_s16 + $0x278] sm:$0xff] %v637_v54  ;;  %v641_v62 = vmul.f32 %v557_v55, %v221_v34 }
  0xa5   : > { %722 = vst [vmem:[%s1115_s16 + $0x280] sm:$0xff] %v638_v52  ;;  %723 = vst [vmem:[%s1115_s16 + $0x288] sm:$0xff] %v639_v56 }
  0xa6   : > { %724 = vst [vmem:[%s1115_s16 + $0x290] sm:$0xff] %v640_v40  ;;  %725 = vst [vmem:[%s1115_s16 + $0x298] sm:$0xff] %v641_v62 }
  0xa7   : > { %919 = shalt.err (!%p916_p10)
}
  0xa8   : > { %s920_s11 = scalar_lea.hbm %s1436_s28, 10752  ;;  %s924_s19 = scalar_lea.hbm %s1484_s1, 21504 }
  0xa9   : > { %p921_p1 = scmp.ne.s32.totalorder %s1436_s28, %s920_s11  ;;  %p925_p0 = scmp.lt.s32.totalorder %s1436_s28, %s1484_s1 }
  0xaa   : > { %p926_p2 = scmp.lt.s32.totalorder %s924_s19, %s920_s11 }
  0xab   : > { %p922_p3 = pnand %p921_p1, %p1493_p12 }
  0xac   : > { %p927_p6 = por %p926_p2, %p925_p0 }
  0xad   : > { %p923_p9 = pneg %p922_p3 }
  0xaf   : > { %p928_p11 = pnand %p927_p6, %p923_p9 }
  0xb1   : > { %931 = shalt.err (!%p928_p11)
}
  0xb2   : > { %s976_s24 = smov 3584   ;;  %s977_s26 = smov 224  }
  0xb3   : > { %828 = dma.vmem_to_hbm [thread:$0]  (%p1493_p12), %s1430_s25, 10752, %s1436_s28, %s727_s30, %s976_s24, %s976_s24, %s977_s26  }
  0xb4 PF: > { %s756_s29 = sand.u32 1, %s958_s6   ;;  %p1494_p13 = scmp.ne.s32.totalorder %s1489_s18, 0 }
  0xb5   : > { %p1495_p4 = scmp.ge.s32.totalorder %s970_s9, 2  ;;  %s757_s16 = scalar_lea.sflag [#allocation4], %s756_s29 }
  0xb7   : > { %p835_p5 = pnand %p1495_p4, %p1494_p13 }
  0xb9   : > { %p836_p7 = pneg %p835_p5 }
  0xbb   : > { %953 = dma.done.wait (%p836_p7), %s757_s16, 10752  }
  0xbc   : > { %955 = vsyncadd (%p836_p7), %s757_s16, 4294956544  ;;  %p14_p8 = scmp.ge.s32.totalorder %s1013_s12, 4   ;;  %s1496_s6 = smov %s962_s7 }
  0xbd   : > { %s1497_s7 = smov %s966_s8  ;;  %s1498_s8 = smov %s1025_s15 }
  0xbe   : > { %s1499_s9 = smov %s1013_s12  ;;  %16 = sbr.rel (!%p14_p8) target bundleno = 5 (0x5), region = 69 }
  0xc3   :  { %762 = vsyncpa [#allocation3], 1 }
  0xc4   :  { %764 = vsyncpa [#allocation3 + $0x1], 1 }
  0xc5   :  { %765 = vsyncpa [#allocation4], 1 }
  0xc6   :  { %767 = vsyncpa [#allocation4 + $0x1], 1 }

</bundles_post_ra>
